<compile_context>
chip_gen: v6e
topology: v6e:2x2x1
jax: 0.10.0
libtpu: 0.0.40
codegen_flags: <defaults>
</compile_context>

<pallas_src>
import jax
import jax.numpy as jnp
from jax.experimental import pallas as pl
from jax.experimental.pallas import tpu as pltpu


_LANE = 128               # lane width (last-dim tiling granularity)
_SUBLANE_BF16 = 16        # bf16 sublane packing granularity
_MAX_TB = 1024            # max batch-tile rows (amortizes grid-step overhead)
_VMEM_SOFT_CAP = 48 << 20     # never request more than this (v7x core = 64 MiB)
_VMEM_TARGET = 44 << 20       # shrink the batch tile beyond this footprint
_RESIDENT_W_LIMIT = 40 << 20  # weights bigger than this -> XLA fallback


def _round_up(x, m):
    return ((x + m - 1) // m) * m


def _pad2(a, rows, cols):
    return jnp.pad(a, ((0, rows - a.shape[0]), (0, cols - a.shape[1])))


def _mlp_kernel(x_ref,
                w1_ref, b1_ref,
                w2_ref, b2_ref,
                w3_ref, b3_ref,
                w4_ref, b4_ref,
                o_ref):
    """layer1..layer4 with ReLU between; dropout == identity (eval mode)."""
    # x / weights are bf16 (MXU-native); accumulate in f32, ReLU in f32,
    # cast back to bf16 only to feed the next matmul.
    h = x_ref[...]

    # layer1 + relu1 (+ dropout1 identity)
    # TODO(synk): training-mode dropout (p=0.5, inverted scaling) would need
    # pltpu.prng_seed / pltpu.prng_random_bits masks; eval mode is identity.
    h = jnp.dot(h, w1_ref[...], preferred_element_type=jnp.float32) + b1_ref[...]
    h = jnp.maximum(h, 0.0).astype(jnp.bfloat16)

    # layer2 + relu2 (+ dropout2 identity)
    h = jnp.dot(h, w2_ref[...], preferred_element_type=jnp.float32) + b2_ref[...]
    h = jnp.maximum(h, 0.0).astype(jnp.bfloat16)

    # layer3 + relu3 (+ dropout3 identity)
    h = jnp.dot(h, w3_ref[...], preferred_element_type=jnp.float32) + b3_ref[...]
    h = jnp.maximum(h, 0.0).astype(jnp.bfloat16)

    # layer4 (logits, no activation) -- lane-dense store
    out = jnp.dot(h, w4_ref[...], preferred_element_type=jnp.float32) + b4_ref[...]
    o_ref[...] = out.astype(o_ref.dtype)


def _vmem_need_bytes(tb, in_p, hid_p, out_p, out_elem_bytes):
    """Estimate kernel VMEM footprint for a given batch tile."""
    w_bytes = 2 * (in_p * hid_p + 2 * hid_p * hid_p + hid_p * out_p)   # bf16, 1-buf
    bias_bytes = 4 * (3 * hid_p + out_p)                               # f32, 1-buf
    act_bytes = 2 * (tb * in_p * 2 + tb * out_p * out_elem_bytes)      # 2-buf streams
    tmp_bytes = 2 * (4 * tb * hid_p)                                   # f32 hidden temps
    return w_bytes + bias_bytes + act_bytes + tmp_bytes


def _pick_batch_tile(batch, in_p, hid_p, out_p, out_elem_bytes):
    b_pad0 = _round_up(max(batch, 1), _SUBLANE_BF16)
    # Aim for >= 2 grid steps so v7x's two TensorCores both get work
    # (no-op cost on v5e/v6e); cap at _MAX_TB rows.
    if b_pad0 > _SUBLANE_BF16:
        tb = min(_MAX_TB, _round_up(pl.cdiv(b_pad0, 2), _SUBLANE_BF16))
    else:
        tb = b_pad0
    # Shrink the tile if we would exceed the VMEM budget (v7x = 64 MiB total).
    while tb > _SUBLANE_BF16 and _vmem_need_bytes(
            tb, in_p, hid_p, out_p, out_elem_bytes) > _VMEM_TARGET:
        tb = max(_SUBLANE_BF16, _round_up(tb // 2, _SUBLANE_BF16))
    b_pad = _round_up(b_pad0, tb)
    return tb, b_pad


def prepare_params(params):
    """Pad + cast weights/biases ONCE (hoisted out of the per-call path).

    Zero padding is exact: padded input columns hit zero weight rows, padded
    hidden lanes stay exactly zero through ReLU.
    """
    (w1, b1), (w2, b2), (w3, b3), (w4, b4) = (
        params["layer1"], params["layer2"], params["layer3"], params["layer4"])
    in_size, hid = w1.shape
    out_size = w4.shape[1]
    in_p = _round_up(in_size, _LANE)
    hid_p = _round_up(hid, _LANE)
    out_p = _round_up(out_size, _LANE)
    padded = {
        "w1": _pad2(w1, in_p, hid_p).astype(jnp.bfloat16),
        "w2": _pad2(w2, hid_p, hid_p).astype(jnp.bfloat16),
        "w3": _pad2(w3, hid_p, hid_p).astype(jnp.bfloat16),
        "w4": _pad2(w4, hid_p, out_p).astype(jnp.bfloat16),
        "b1": _pad2(b1, 1, hid_p).astype(jnp.float32),
        "b2": _pad2(b2, 1, hid_p).astype(jnp.float32),
        "b3": _pad2(b3, 1, hid_p).astype(jnp.float32),
        "b4": _pad2(b4, 1, out_p).astype(jnp.float32),
    }
    dims = {"in_size": in_size, "hid": hid, "out_size": out_size,
            "in_p": in_p, "hid_p": hid_p, "out_p": out_p}
    return padded, dims


def make_forward(params, *, out_dtype=jnp.float32, use_pallas=None):
    """Build a jitted forward fn.  use_pallas: True / False / None (auto)."""
    padded, dims = prepare_params(params)
    in_size, out_size = dims["in_size"], dims["out_size"]
    in_p, hid_p, out_p = dims["in_p"], dims["hid_p"], dims["out_p"]
    out_elem_bytes = jnp.dtype(out_dtype).itemsize
    resident_w_bytes = 2 * (in_p * hid_p + 2 * hid_p * hid_p + hid_p * out_p)

    def _pallas_forward(xp, p, tb, b_pad):
        nb = b_pad // tb
        # activations stream over the batch grid
        x_spec = pl.BlockSpec((tb, in_p), lambda i: (i, 0))
        o_spec = pl.BlockSpec((tb, out_p), lambda i: (i, 0))
        # constant index_map (no re-DMA across batch tiles) + single buffering
        # (no doubled VMEM footprint) for the resident weights/biases.
        resident = lambda a: pl.BlockSpec(a.shape, lambda i: (0, 0),
                                          pipeline_mode=pl.Buffered(1))
        vmem_need = _vmem_need_bytes(tb, in_p, hid_p, out_p, out_elem_bytes)
        vmem_limit = int(min(_VMEM_SOFT_CAP, max(vmem_need + (4 << 20), 16 << 20)))
        return pl.pallas_call(
            _mlp_kernel,
            out_shape=jax.ShapeDtypeStruct((b_pad, out_p), out_dtype),
            grid_spec=pltpu.PrefetchScalarGridSpec(
                num_scalar_prefetch=0,
                grid=(nb,),
                in_specs=[x_spec,
                          resident(p["w1"]), resident(p["b1"]),
                          resident(p["w2"]), resident(p["b2"]),
                          resident(p["w3"]), resident(p["b3"]),
                          resident(p["w4"]), resident(p["b4"])],
                out_specs=o_spec,
            ),
            compiler_params=pltpu.CompilerParams(
                dimension_semantics=("parallel",),   # v7x: shard batch over 2 TCs
                vmem_limit_bytes=vmem_limit,
            ),
        )(xp, p["w1"], p["b1"], p["w2"], p["b2"],
          p["w3"], p["b3"], p["w4"], p["b4"])

    def _xla_forward(x, p):
        # Tiny-shape / oversized-weight bypass: XLA's fused matmuls win when
        # the grid would have one step of ~KFLOP work behind 10 DMAs.
        b = x.shape[0]
        h = _pad2(x.astype(jnp.bfloat16), b, in_p)

        def dense(h, w, bias):
            return jnp.dot(h.astype(jnp.bfloat16), w,
                           preferred_element_type=jnp.float32) + bias

        h = jnp.maximum(dense(h, p["w1"], p["b1"]), 0.0)
        h = jnp.maximum(dense(h, p["w2"], p["b2"]), 0.0)
        h = jnp.maximum(dense(h, p["w3"], p["b3"]), 0.0)
        out = dense(h, p["w4"], p["b4"])
        return out[:, :out_size].astype(out_dtype)

    @jax.jit
    def _fwd(x, p):
        batch = x.shape[0]
        pallas_ok = resident_w_bytes <= _RESIDENT_W_LIMIT
        # TODO(synk): for padded weights > ~40 MiB a K-tiled / per-layer Pallas
        # path would be needed; here we fall back to XLA in auto mode.
        if use_pallas is None:
            run_pallas = pallas_ok and batch >= 64
        else:
            run_pallas = bool(use_pallas)
        if not run_pallas:
            return _xla_forward(x, p)
        tb, b_pad = _pick_batch_tile(batch, in_p, hid_p, out_p, out_elem_bytes)
        # TODO(synk): for very large B, cast x to bf16 inside the kernel (full
        # in_size block on the lane dim) to avoid this wrapper pad+cast pass.
        xp = _pad2(x.astype(jnp.bfloat16), b_pad, in_p)
        out_padded = _pallas_forward(xp, p, tb, b_pad)
        return out_padded[:batch, :out_size]

    def forward(x):
        return _fwd(x, padded)

    return forward


def init_params(key, input_size, hidden_size, output_size):
    """Deterministic init mimicking nn.Linear default (U[-1/sqrt(fan_in), ..])."""
    def linear(k, fan_in, fan_out):
        kw, kb = jax.random.split(k)
        bound = 1.0 / jnp.sqrt(fan_in)
        w = jax.random.uniform(kw, (fan_in, fan_out), jnp.float32, -bound, bound)
        b = jax.random.uniform(kb, (1, fan_out), jnp.float32, -bound, bound)
        return w, b

    k1, k2, k3, k4 = jax.random.split(key, 4)
    return {
        "layer1": linear(k1, input_size, hidden_size),
        "layer2": linear(k2, hidden_size, hidden_size),
        "layer3": linear(k3, hidden_size, hidden_size),
        "layer4": linear(k4, input_size and hidden_size, output_size),
    }


def reference_forward(x, params):
    """Pure-JAX reference with the same bf16-in / f32-accumulate numerics."""
    def dense(h, w, b):
        return jnp.dot(h.astype(jnp.bfloat16), w.astype(jnp.bfloat16),
                       preferred_element_type=jnp.float32) + b

    (w1, b1), (w2, b2), (w3, b3), (w4, b4) = (
        params["layer1"], params["layer2"], params["layer3"], params["layer4"])
    h = jnp.maximum(dense(x, w1, b1), 0.0)
    h = jnp.maximum(dense(h, w2, b2), 0.0)
    h = jnp.maximum(dense(h, w3, b3), 0.0)
    return dense(h, w4, b4)


if __name__ == "__main__":
    # combined_input = [meal_time, gender, age_range, residence] + weather
    # features -> small input_size; 8 features, hidden 32, 16 classes, batch 2.
    batch, input_size, hidden_size, output_size = 2, 8, 32, 16

    key = jax.random.PRNGKey(0)
    kx, kp, kx2 = jax.random.split(key, 3)
    x_small = jax.random.normal(kx, (batch, input_size), jnp.float32)
    params = init_params(kp, input_size, hidden_size, output_size)

    # 1) Forced-Pallas path at the small demo shape (exercises the kernel).
    fwd_pallas = make_forward(params, use_pallas=True)
    out = jax.block_until_ready(fwd_pallas(x_small))
    ref = reference_forward(x_small, params)
    assert out.shape == (batch, output_size)
    assert jnp.allclose(out, ref, atol=2e-3, rtol=2e-3), (
        float(jnp.max(jnp.abs(out - ref))))

    # 2) Auto mode at the tiny shape takes the XLA bypass; must match too.
    fwd_auto = make_forward(params)
    out_auto = jax.block_until_ready(fwd_auto(x_small))
    assert jnp.allclose(out_auto, ref, atol=2e-3, rtol=2e-3)

    # 3) Larger batch through auto mode -> Pallas with >= 2 grid steps
    #    (v7x megacore sharding path) and the hoisted prepared params.
    x_big = jax.random.normal(kx2, (256, input_size), jnp.float32)
    out_big = jax.block_until_ready(fwd_auto(x_big))
    ref_big = reference_forward(x_big, params)
    assert out_big.shape == (256, output_size)
    assert jnp.allclose(out_big, ref_big, atol=2e-3, rtol=2e-3)

    print("KERNEL_OK")
</pallas_src>

<mosaic_0001>
module attributes {stable_mosaic.version = 11 : i64} {
  func.func @_mlp_kernel(%arg0: i32, %arg1: memref<16x128xbf16, #tpu.memory_space<vmem>>, %arg2: memref<128x128xbf16, #tpu.memory_space<vmem>>, %arg3: memref<1x128xf32, #tpu.memory_space<vmem>>, %arg4: memref<128x128xbf16, #tpu.memory_space<vmem>>, %arg5: memref<1x128xf32, #tpu.memory_space<vmem>>, %arg6: memref<128x128xbf16, #tpu.memory_space<vmem>>, %arg7: memref<1x128xf32, #tpu.memory_space<vmem>>, %arg8: memref<128x128xbf16, #tpu.memory_space<vmem>>, %arg9: memref<1x128xf32, #tpu.memory_space<vmem>>, %arg10: memref<16x128xf32, #tpu.memory_space<vmem>>) attributes {dimension_semantics = [#tpu.dimension_semantics<parallel>], iteration_bounds = array<i64: 1>, scalar_prefetch = 0 : i64, scratch_operands = 0 : i64, tpu.core_type = #tpu.core_type<tc>, window_params = [{transform_indices = @transform_0, window_bounds = array<i64: 16, 128>}, {pipeline_mode = #tpu.pipeline_mode<synchronous>, transform_indices = @transform_1, window_bounds = array<i64: 128, 128>}, {pipeline_mode = #tpu.pipeline_mode<synchronous>, transform_indices = @transform_2, window_bounds = array<i64: 1, 128>}, {pipeline_mode = #tpu.pipeline_mode<synchronous>, transform_indices = @transform_3, window_bounds = array<i64: 128, 128>}, {pipeline_mode = #tpu.pipeline_mode<synchronous>, transform_indices = @transform_4, window_bounds = array<i64: 1, 128>}, {pipeline_mode = #tpu.pipeline_mode<synchronous>, transform_indices = @transform_5, window_bounds = array<i64: 128, 128>}, {pipeline_mode = #tpu.pipeline_mode<synchronous>, transform_indices = @transform_6, window_bounds = array<i64: 1, 128>}, {pipeline_mode = #tpu.pipeline_mode<synchronous>, transform_indices = @transform_7, window_bounds = array<i64: 128, 128>}, {pipeline_mode = #tpu.pipeline_mode<synchronous>, transform_indices = @transform_8, window_bounds = array<i64: 1, 128>}, {transform_indices = @transform_9, window_bounds = array<i64: 16, 128>}]} {
    %c0 = arith.constant 0 : index
    %c0_0 = arith.constant 0 : index
    %0 = vector.load %arg1[%c0, %c0_0] : memref<16x128xbf16, #tpu.memory_space<vmem>>, vector<16x128xbf16>
    %c0_1 = arith.constant 0 : index
    %c0_2 = arith.constant 0 : index
    %1 = vector.load %arg2[%c0_1, %c0_2] : memref<128x128xbf16, #tpu.memory_space<vmem>>, vector<128x128xbf16>
    %cst = arith.constant dense<0.000000e+00> : vector<16x128xf32>
    %2 = tpu.matmul %0, %1, %cst {dimension_numbers = #tpu.dot_dimension_numbers<[1], [0], [0], [1], [0, 0, 1, 1], [], []>} : vector<16x128xbf16>, vector<128x128xbf16>, vector<16x128xf32> -> vector<16x128xf32>
    %c0_3 = arith.constant 0 : index
    %c0_4 = arith.constant 0 : index
    %3 = vector.load %arg3[%c0_3, %c0_4] : memref<1x128xf32, #tpu.memory_space<vmem>>, vector<1x128xf32>
    %4 = vector.broadcast %3 : vector<1x128xf32> to vector<16x128xf32>
    %5 = arith.addf %2, %4 : vector<16x128xf32>
    %cst_5 = arith.constant 0.000000e+00 : f32
    %6 = vector.broadcast %cst_5 : f32 to vector<16x128xf32>
    %7 = arith.maximumf %5, %6 : vector<16x128xf32>
    %8 = arith.truncf %7 : vector<16x128xf32> to vector<16x128xbf16>
    %c0_6 = arith.constant 0 : index
    %c0_7 = arith.constant 0 : index
    %9 = vector.load %arg4[%c0_6, %c0_7] : memref<128x128xbf16, #tpu.memory_space<vmem>>, vector<128x128xbf16>
    %cst_8 = arith.constant dense<0.000000e+00> : vector<16x128xf32>
    %10 = tpu.matmul %8, %9, %cst_8 {dimension_numbers = #tpu.dot_dimension_numbers<[1], [0], [0], [1], [0, 0, 1, 1], [], []>} : vector<16x128xbf16>, vector<128x128xbf16>, vector<16x128xf32> -> vector<16x128xf32>
    %c0_9 = arith.constant 0 : index
    %c0_10 = arith.constant 0 : index
    %11 = vector.load %arg5[%c0_9, %c0_10] : memref<1x128xf32, #tpu.memory_space<vmem>>, vector<1x128xf32>
    %12 = vector.broadcast %11 : vector<1x128xf32> to vector<16x128xf32>
    %13 = arith.addf %10, %12 : vector<16x128xf32>
    %cst_11 = arith.constant 0.000000e+00 : f32
    %14 = vector.broadcast %cst_11 : f32 to vector<16x128xf32>
    %15 = arith.maximumf %13, %14 : vector<16x128xf32>
    %16 = arith.truncf %15 : vector<16x128xf32> to vector<16x128xbf16>
    %c0_12 = arith.constant 0 : index
    %c0_13 = arith.constant 0 : index
    %17 = vector.load %arg6[%c0_12, %c0_13] : memref<128x128xbf16, #tpu.memory_space<vmem>>, vector<128x128xbf16>
    %cst_14 = arith.constant dense<0.000000e+00> : vector<16x128xf32>
    %18 = tpu.matmul %16, %17, %cst_14 {dimension_numbers = #tpu.dot_dimension_numbers<[1], [0], [0], [1], [0, 0, 1, 1], [], []>} : vector<16x128xbf16>, vector<128x128xbf16>, vector<16x128xf32> -> vector<16x128xf32>
    %c0_15 = arith.constant 0 : index
    %c0_16 = arith.constant 0 : index
    %19 = vector.load %arg7[%c0_15, %c0_16] : memref<1x128xf32, #tpu.memory_space<vmem>>, vector<1x128xf32>
    %20 = vector.broadcast %19 : vector<1x128xf32> to vector<16x128xf32>
    %21 = arith.addf %18, %20 : vector<16x128xf32>
    %cst_17 = arith.constant 0.000000e+00 : f32
    %22 = vector.broadcast %cst_17 : f32 to vector<16x128xf32>
    %23 = arith.maximumf %21, %22 : vector<16x128xf32>
    %24 = arith.truncf %23 : vector<16x128xf32> to vector<16x128xbf16>
    %c0_18 = arith.constant 0 : index
    %c0_19 = arith.constant 0 : index
    %25 = vector.load %arg8[%c0_18, %c0_19] : memref<128x128xbf16, #tpu.memory_space<vmem>>, vector<128x128xbf16>
    %cst_20 = arith.constant dense<0.000000e+00> : vector<16x128xf32>
    %26 = tpu.matmul %24, %25, %cst_20 {dimension_numbers = #tpu.dot_dimension_numbers<[1], [0], [0], [1], [0, 0, 1, 1], [], []>} : vector<16x128xbf16>, vector<128x128xbf16>, vector<16x128xf32> -> vector<16x128xf32>
    %c0_21 = arith.constant 0 : index
    %c0_22 = arith.constant 0 : index
    %27 = vector.load %arg9[%c0_21, %c0_22] : memref<1x128xf32, #tpu.memory_space<vmem>>, vector<1x128xf32>
    %28 = vector.broadcast %27 : vector<1x128xf32> to vector<16x128xf32>
    %29 = arith.addf %26, %28 : vector<16x128xf32>
    %c0_23 = arith.constant 0 : index
    %c0_24 = arith.constant 0 : index
    %30 = vector.load %arg10[%c0_23, %c0_24] : memref<16x128xf32, #tpu.memory_space<vmem>>, vector<16x128xf32>
    tpu.vector_store %arg10[%c0_23, %c0_24], %29 {strides = array<i32>} : memref<16x128xf32, #tpu.memory_space<vmem>>, vector<16x128xf32>,
    return
  }
  func.func @transform_0(%arg0: i32) -> (i32, i32) {
    %c0_i32 = arith.constant 0 : i32
    %c0_i32_0 = arith.constant 0 : i32
    return %arg0, %c0_i32 : i32, i32
  }
  func.func @transform_1(%arg0: i32) -> (i32, i32) {
    %c0_i32 = arith.constant 0 : i32
    %c0_i32_0 = arith.constant 0 : i32
    %c0_i32_1 = arith.constant 0 : i32
    return %c0_i32, %c0_i32_0 : i32, i32
  }
  func.func @transform_2(%arg0: i32) -> (i32, i32) {
    %c0_i32 = arith.constant 0 : i32
    %c0_i32_0 = arith.constant 0 : i32
    %c0_i32_1 = arith.constant 0 : i32
    return %c0_i32, %c0_i32_0 : i32, i32
  }
  func.func @transform_3(%arg0: i32) -> (i32, i32) {
    %c0_i32 = arith.constant 0 : i32
    %c0_i32_0 = arith.constant 0 : i32
    %c0_i32_1 = arith.constant 0 : i32
    return %c0_i32, %c0_i32_0 : i32, i32
  }
  func.func @transform_4(%arg0: i32) -> (i32, i32) {
    %c0_i32 = arith.constant 0 : i32
    %c0_i32_0 = arith.constant 0 : i32
    %c0_i32_1 = arith.constant 0 : i32
    return %c0_i32, %c0_i32_0 : i32, i32
  }
  func.func @transform_5(%arg0: i32) -> (i32, i32) {
    %c0_i32 = arith.constant 0 : i32
    %c0_i32_0 = arith.constant 0 : i32
    %c0_i32_1 = arith.constant 0 : i32
    return %c0_i32, %c0_i32_0 : i32, i32
  }
  func.func @transform_6(%arg0: i32) -> (i32, i32) {
    %c0_i32 = arith.constant 0 : i32
    %c0_i32_0 = arith.constant 0 : i32
    %c0_i32_1 = arith.constant 0 : i32
    return %c0_i32, %c0_i32_0 : i32, i32
  }
  func.func @transform_7(%arg0: i32) -> (i32, i32) {
    %c0_i32 = arith.constant 0 : i32
    %c0_i32_0 = arith.constant 0 : i32
    %c0_i32_1 = arith.constant 0 : i32
    return %c0_i32, %c0_i32_0 : i32, i32
  }
  func.func @transform_8(%arg0: i32) -> (i32, i32) {
    %c0_i32 = arith.constant 0 : i32
    %c0_i32_0 = arith.constant 0 : i32
    %c0_i32_1 = arith.constant 0 : i32
    return %c0_i32, %c0_i32_0 : i32, i32
  }
  func.func @transform_9(%arg0: i32) -> (i32, i32) {
    %c0_i32 = arith.constant 0 : i32
    %c0_i32_0 = arith.constant 0 : i32
    return %arg0, %c0_i32 : i32, i32
  }
}

</mosaic_0001>

<bundles_post_ra>
// kernel: _fwd.1
= control target key start
LH: loop header
LB: loop body
LE: loop exit
PB: predicated region body
PF: predicated region fallthrough
CT: control target
= control target key end

     0   :  { %14 = vsyncpa [#allocation3], 0  ;;  %s985_s0 = inlined_call_operand.vmem [shape: bf16[16,128], index: 0, kind: input, shape index: {}]   ;;  %s986_s1 = inlined_call_operand.hbm [shape: bf16[128,128], index: 1, kind: input, shape index: {}]   ;;  %s987_s2 = inlined_call_operand.vmem [shape: f32[1,128], index: 2, kind: input, shape index: {}]   ;;  %s988_s3 = inlined_call_operand.hbm [shape: bf16[128,128], index: 3, kind: input, shape index: {}]   ;;  %s989_s4 = inlined_call_operand.vmem [shape: f32[1,128], index: 4, kind: input, shape index: {}]   ;;  %s990_s5 = inlined_call_operand.hbm [shape: bf16[128,128], index: 5, kind: input, shape index: {}]   ;;  %s991_s6 = inlined_call_operand.vmem [shape: f32[1,128], index: 6, kind: input, shape index: {}]   ;;  %s992_s7 = inlined_call_operand.hbm [shape: bf16[128,128], index: 7, kind: input, shape index: {}]   ;;  %s993_s8 = inlined_call_operand.vmem [shape: f32[1,128], index: 8, kind: input, shape index: {}]   ;;  %s994_s9 = inlined_call_operand.vmem [shape: f32[16,128], index: 9, kind: output, shape index: {}]  }
   0x1   :  { %15 = vsyncpa [#allocation5], 0 }
   0x2   :  { %16 = vsyncpa [#allocation8], 0  ;;  %s842_s30 = smov [#allocation4]   ;;  %s843_s11 = smov [#allocation2]  }
   0x3   :  { %s38_s10 = sshll.u32 %s842_s30, 4  ;;  %s24_s12 = sshll.u32 %s843_s11, 4  ;;  %s39_s10 = int_to_ptr.vmem [resolvable:$true] %s38_s10  ;;  %s25_s12 = int_to_ptr.vmem [resolvable:$true] %s24_s12 }
   0x4   :  { %s764_s13 = scalar_lea.vmem %s39_s10, 1024  ;;  %p769_p1 = scmp.lt.s32.totalorder %s39_s10, %s39_s10 }
   0x5   :  { %p765_p0 = scmp.ne.s32.totalorder %s39_s10, %s764_s13  ;;  %p770_p2 = scmp.lt.s32.totalorder %s764_s13, %s764_s13 }
   0x7   :  { %p771_p3 = por %p770_p2, %p769_p1 }
   0x9   :  { %p772_p4 = pnand %p771_p3, %p765_p0 }
   0xb   :  { %775 = shalt.err (!%p772_p4)
}
   0xc   :  { %s844_s14 = smov 64   ;;  %s845_s15 = smov 4  }
   0xd   :  { %44 = dma.hbm_to_vmem [thread:$0]  %s988_s3, 1024, %s39_s10, [#allocation5], %s844_s14, %s844_s14, %s845_s15  }
   0xe   :  { %s784_s18 = scalar_lea.vmem %s25_s12, 1024  ;;  %p789_p6 = scmp.lt.s32.totalorder %s25_s12, %s25_s12 }
   0xf   :  { %p785_p5 = scmp.ne.s32.totalorder %s25_s12, %s784_s18  ;;  %p790_p7 = scmp.lt.s32.totalorder %s784_s18, %s784_s18 }
  0x11   :  { %p791_p8 = por %p790_p7, %p789_p6 }
  0x13   :  { %p792_p9 = pnand %p791_p8, %p785_p5 }
  0x15   :  { %795 = shalt.err (!%p792_p9)
}
  0x16   :  { %30 = dma.hbm_to_vmem [thread:$0]  %s986_s1, 1024, %s25_s12, [#allocation3], %s844_s14, %s844_s14, %s845_s15  }
  0x17   :  { %s846_s21 = smov [#allocation6]   ;;  %s847_s23 = smov [#allocation7]  }
  0x18   :  { %s52_s22 = sshll.u32 %s846_s21, 4  ;;  %s66_s24 = sshll.u32 %s847_s23, 4  ;;  %s53_s22 = int_to_ptr.vmem [resolvable:$true] %s52_s22  ;;  %s67_s24 = int_to_ptr.vmem [resolvable:$true] %s66_s24 }
  0x19   :  { %s804_s3 = scalar_lea.vmem %s53_s22, 1024  ;;  %p809_p11 = scmp.lt.s32.totalorder %s53_s22, %s53_s22 }
  0x1a   :  { %p805_p10 = scmp.ne.s32.totalorder %s53_s22, %s804_s3  ;;  %p810_p12 = scmp.lt.s32.totalorder %s804_s3, %s804_s3 }
  0x1c   :  { %p811_p13 = por %p810_p12, %p809_p11 }
  0x1e   :  { %p812_p0 = pnand %p811_p13, %p805_p10 }
  0x20   :  { %815 = shalt.err (!%p812_p0)
}
  0x21   :  { %58 = dma.hbm_to_vmem [thread:$0]  %s990_s5, 1024, %s53_s22, [#allocation5], %s844_s14, %s844_s14, %s845_s15  }
  0x22   :  { %s824_s1 = scalar_lea.vmem %s67_s24, 1024  ;;  %p829_p2 = scmp.lt.s32.totalorder %s67_s24, %s67_s24 }
  0x23   :  { %p825_p1 = scmp.ne.s32.totalorder %s67_s24, %s824_s1  ;;  %p830_p3 = scmp.lt.s32.totalorder %s824_s1, %s824_s1 }
  0x25   :  { %p831_p4 = por %p830_p3, %p829_p2 }
  0x27   :  { %p832_p5 = pnand %p831_p4, %p825_p1 }
  0x29   :  { %835 = shalt.err (!%p832_p5)
}
  0x2a   :  { %72 = dma.hbm_to_vmem [thread:$0]  %s992_s7, 1024, %s67_s24, [#allocation8], %s844_s14, %s844_s14, %s845_s15  }
  0x2b   :  { %836 = dma.done.wait [#allocation3], 1024  }
  0x2c   :  { %837 = vsyncadd [#allocation3], 4294966272 }
  0x2d   :  { %838 = dma.done.wait [#allocation5], 2048  }
  0x2e   :  { %839 = vsyncadd [#allocation5], 4294965248 }
  0x2f   :  { %840 = dma.done.wait [#allocation8], 1024  }
  0x30   :  { %841 = vsyncadd [#allocation8], 4294966272  ;;  %v848_v0 = vmov 0.0   ;;  %vm849_vm0 = vmmov 0   ;;  %v723_v1 = vld [vmem:[#allocation2 + $0x38] sm:$0xff]   ;;  %v724_v2 = vld [vmem:[#allocation2 + $0x30] sm:$0xff]  }
  0x31   :  { %635 = vmatprep.subr.bf16.mxu0 %v848_v0  ;;  %651 = vmatprep.mubr.msk.bf16.mxu0 %vm849_vm0, %v848_v0  ;;  %v725_v3 = vld [vmem:[#allocation2 + $0x28] sm:$0xff]   ;;  %v732_v4 = vld [vmem:[#allocation4 + $0x38] sm:$0xff]   ;;  %v726_v5 = vld [vmem:[#allocation2 + $0x20] sm:$0xff]  }
  0x32   :  { %655 = vmatprep.subr.bf16.mxu1 %v848_v0  ;;  %671 = vmatprep.mubr.msk.bf16.mxu1 %vm849_vm0, %v848_v0  ;;  %v733_v6 = vld [vmem:[#allocation4 + $0x30] sm:$0xff]   ;;  %v727_v7 = vld [vmem:[#allocation2 + $0x18] sm:$0xff]   ;;  %v734_v8 = vld [vmem:[#allocation4 + $0x28] sm:$0xff]  }
  0x33   :  { %636 = vmatpush3.bf16.msra.mxu0 %v723_v1  ;;  %656 = vmatpush3.bf16.msra.mxu1 %v732_v4  ;;  %v728_v9 = vld [vmem:[#allocation2 + $0x10] sm:$0xff]   ;;  %v735_v10 = vld [vmem:[#allocation4 + $0x20] sm:$0xff]   ;;  %v729_v11 = vld [vmem:[#allocation2 + $0x8] sm:$0xff]  }
  0x34   :  { %637 = vmatprep.subr.bf16.mxu0 %v848_v0  ;;  %657 = vmatprep.subr.bf16.mxu1 %v848_v0  ;;  %v736_v12 = vld [vmem:[#allocation4 + $0x18] sm:$0xff]   ;;  %v730_v13 = vld [vmem:[#allocation2] sm:$0xff]   ;;  %v737_v15 = vld [vmem:[#allocation4 + $0x10] sm:$0xff]  }
  0x35   :  { %v731_v14 = vld [vmem:[%s985_s0] sm:$0xff]   ;;  %v738_v16 = vld [vmem:[#allocation4 + $0x8] sm:$0xff]   ;;  %v740_v18 = vld [vmem:[#allocation6 + $0x38] sm:$0xff]  }
  0x36   :  { %v739_v17 = vld [vmem:[#allocation4] sm:$0xff]   ;;  %v741_v19 = vld [vmem:[#allocation6 + $0x30] sm:$0xff]   ;;  %v742_v20 = vld [vmem:[#allocation6 + $0x28] sm:$0xff]  }
  0x37   :  { %638 = vmatpush3.bf16.msra.mxu0 %v724_v2  ;;  %658 = vmatpush3.bf16.msra.mxu1 %v733_v6  ;;  %v743_v21 = vld [vmem:[#allocation6 + $0x20] sm:$0xff]   ;;  %v744_v22 = vld [vmem:[#allocation6 + $0x18] sm:$0xff]   ;;  %v745_v33 = vld [vmem:[#allocation6 + $0x10] sm:$0xff]  }
  0x38   :  { %639 = vmatprep.subr.bf16.mxu0 %v848_v0  ;;  %659 = vmatprep.subr.bf16.mxu1 %v848_v0  ;;  %v562_v23 = vld [vmem:[%s987_s2] ss:$0 sm:$0xff]  ;;  %v746_v34 = vld [vmem:[#allocation6 + $0x8] sm:$0xff]   ;;  %v748_v36 = vld [vmem:[#allocation7 + $0x38] sm:$0xff]  }
  0x39   :  { %v747_v35 = vld [vmem:[#allocation6] sm:$0xff]   ;;  %v749_v37 = vld [vmem:[#allocation7 + $0x30] sm:$0xff]   ;;  %v750_v38 = vld [vmem:[#allocation7 + $0x28] sm:$0xff]  }
  0x3a   :  { %v751_v39 = vld [vmem:[#allocation7 + $0x20] sm:$0xff]   ;;  %v752_v40 = vld [vmem:[#allocation7 + $0x18] sm:$0xff]   ;;  %v753_v51 = vld [vmem:[#allocation7 + $0x10] sm:$0xff]  }
  0x3b   :  { %640 = vmatpush3.bf16.msra.mxu0 %v725_v3  ;;  %660 = vmatpush3.bf16.msra.mxu1 %v734_v8  ;;  %v572_v41 = vld [vmem:[%s989_s4] ss:$0 sm:$0xff]  ;;  %v754_v52 = vld [vmem:[#allocation7 + $0x8] sm:$0xff]  }
  0x3c   :  { %641 = vmatprep.subr.bf16.mxu0 %v848_v0  ;;  %661 = vmatprep.subr.bf16.mxu1 %v848_v0  ;;  %v755_v53 = vld [vmem:[#allocation7] sm:$0xff]  }
  0x3d   :  { %v581_v54 = vld [vmem:[%s991_s6] ss:$0 sm:$0xff] }
  0x3f   :  { %642 = vmatpush3.bf16.msra.mxu0 %v726_v5  ;;  %662 = vmatpush3.bf16.msra.mxu1 %v735_v10 }
  0x40   :  { %643 = vmatprep.subr.bf16.mxu0 %v848_v0  ;;  %663 = vmatprep.subr.bf16.mxu1 %v848_v0 }
  0x43   :  { %644 = vmatpush3.bf16.msra.mxu0 %v727_v7  ;;  %664 = vmatpush3.bf16.msra.mxu1 %v736_v12 }
  0x44   :  { %645 = vmatprep.subr.bf16.mxu0 %v848_v0  ;;  %665 = vmatprep.subr.bf16.mxu1 %v848_v0 }
  0x47   :  { %646 = vmatpush3.bf16.msra.mxu0 %v728_v9  ;;  %666 = vmatpush3.bf16.msra.mxu1 %v737_v15 }
  0x48   :  { %647 = vmatprep.subr.bf16.mxu0 %v848_v0  ;;  %667 = vmatprep.subr.bf16.mxu1 %v848_v0 }
  0x4b   :  { %648 = vmatpush3.bf16.msra.mxu0 %v729_v11  ;;  %668 = vmatpush3.bf16.msra.mxu1 %v738_v16 }
  0x4c   :  { %649 = vmatprep.subr.bf16.mxu0 %v848_v0  ;;  %669 = vmatprep.subr.bf16.mxu1 %v848_v0 }
  0x4f   :  { %650 = vmatpush3.bf16.msra.mxu0 %v730_v13  ;;  %670 = vmatpush3.bf16.msra.mxu1 %v739_v17 }
  0x50   :  { %675 = vmatprep.subr.bf16.mxu0 %v848_v0  ;;  %695 = vmatprep.subr.bf16.mxu1 %v848_v0 }
  0x52   :  { %652 = vmatmul.mubr.bf16.vlgmr.msra.gmra.mxu0 %v731_v14 }
  0x53   :  { %691 = vmatprep.mubr.msk.bf16.mxu0 %vm849_vm0, %v848_v0  ;;  %676 = vmatpush3.bf16.msra.mxu0 %v740_v18 }
  0x54   :  { %677 = vmatprep.subr.bf16.mxu0 %v848_v0 }
  0x57   :  { %678 = vmatpush3.bf16.msra.mxu0 %v741_v19 }
  0x58   :  { %679 = vmatprep.subr.bf16.mxu0 %v848_v0 }
  0x5b   :  { %680 = vmatpush3.bf16.msra.mxu0 %v742_v20 }
  0x5c   :  { %681 = vmatprep.subr.bf16.mxu0 %v848_v0 }
  0x5f   :  { %682 = vmatpush3.bf16.msra.mxu0 %v743_v21 }
  0x60   :  { %683 = vmatprep.subr.bf16.mxu0 %v848_v0 }
  0x63   :  { %684 = vmatpush3.bf16.msra.mxu0 %v744_v22 }
  0x64   :  { %685 = vmatprep.subr.bf16.mxu0 %v848_v0 }
  0x67   :  { %686 = vmatpush3.bf16.msra.mxu0 %v745_v33 }
  0x68   :  { %687 = vmatprep.subr.bf16.mxu0 %v848_v0 }
  0x6b   :  { %688 = vmatpush3.bf16.msra.mxu0 %v746_v34 }
  0x6c   :  { %689 = vmatprep.subr.bf16.mxu0 %v848_v0 }
  0x6f   :  { %690 = vmatpush3.bf16.msra.mxu0 %v747_v35 }
 0x112   :  { %v201_v24 = vpop.f32.mrf.mxu0 }
 0x113   :  { %v202_v26 = vadd.f32 %v562_v23, %v201_v24 }
 0x114   :  { %v653_v25 = vpop.f32.mrf.mxu0 }
 0x115   :  { %v208_v30 = vmax.f32 %v202_v26, 0.0 }
 0x116   :  { %v204_v27 = vpop.f32.mrf.mxu0 }
 0x117   :  { %v205_v28 = vadd.f32 %v562_v23, %v204_v27 }
 0x118   :  { %v654_v29 = vpop.f32.mrf.mxu0 }
 0x119   :  { %v209_v31 = vmax.f32 %v205_v28, 0.0 }
 0x11b   :  { %v210_v32 = vpack.c.bf16 %v209_v31, %v208_v30 }
 0x11d   :  { %672 = vmatmul.mubr.bf16.vlgmr.msra.gmra.mxu1 %v210_v32 }
 0x11e   :  { %711 = vmatprep.mubr.msk.bf16.mxu1 %vm849_vm0, %v848_v0  ;;  %696 = vmatpush3.bf16.msra.mxu1 %v748_v36 }
 0x11f   :  { %697 = vmatprep.subr.bf16.mxu1 %v848_v0 }
 0x122   :  { %698 = vmatpush3.bf16.msra.mxu1 %v749_v37 }
 0x123   :  { %699 = vmatprep.subr.bf16.mxu1 %v848_v0 }
 0x126   :  { %700 = vmatpush3.bf16.msra.mxu1 %v750_v38 }
 0x127   :  { %701 = vmatprep.subr.bf16.mxu1 %v848_v0 }
 0x12a   :  { %702 = vmatpush3.bf16.msra.mxu1 %v751_v39 }
 0x12b   :  { %703 = vmatprep.subr.bf16.mxu1 %v848_v0 }
 0x12e   :  { %704 = vmatpush3.bf16.msra.mxu1 %v752_v40 }
 0x12f   :  { %705 = vmatprep.subr.bf16.mxu1 %v848_v0 }
 0x132   :  { %706 = vmatpush3.bf16.msra.mxu1 %v753_v51 }
 0x133   :  { %707 = vmatprep.subr.bf16.mxu1 %v848_v0 }
 0x136   :  { %708 = vmatpush3.bf16.msra.mxu1 %v754_v52 }
 0x137   :  { %709 = vmatprep.subr.bf16.mxu1 %v848_v0  ;;  %v590_v0 = vld [vmem:[%s993_s8] ss:$0 sm:$0xff] }
 0x13a   :  { %710 = vmatpush3.bf16.msra.mxu1 %v755_v53 }
 0x1dd   :  { %v316_v42 = vpop.f32.mrf.mxu1 }
 0x1de   :  { %v317_v44 = vadd.f32 %v572_v41, %v316_v42 }
 0x1df   :  { %v673_v43 = vpop.f32.mrf.mxu1 }
 0x1e0   :  { %v323_v48 = vmax.f32 %v317_v44, 0.0 }
 0x1e1   :  { %v319_v45 = vpop.f32.mrf.mxu1 }
 0x1e2   :  { %v320_v46 = vadd.f32 %v572_v41, %v319_v45 }
 0x1e3   :  { %v674_v47 = vpop.f32.mrf.mxu1 }
 0x1e4   :  { %v324_v49 = vmax.f32 %v320_v46, 0.0 }
 0x1e6   :  { %v325_v50 = vpack.c.bf16 %v324_v49, %v323_v48 }
 0x1e8   :  { %692 = vmatmul.mubr.bf16.vlgmr.msra.gmra.mxu0 %v325_v50 }
 0x2a8   :  { %v431_v55 = vpop.f32.mrf.mxu0 }
 0x2a9   :  { %v432_v57 = vadd.f32 %v581_v54, %v431_v55 }
 0x2aa   :  { %v693_v56 = vpop.f32.mrf.mxu0 }
 0x2ab   :  { %v438_v61 = vmax.f32 %v432_v57, 0.0 }
 0x2ac   :  { %v434_v58 = vpop.f32.mrf.mxu0 }
 0x2ad   :  { %v435_v59 = vadd.f32 %v581_v54, %v434_v58 }
 0x2ae   :  { %v694_v60 = vpop.f32.mrf.mxu0 }
 0x2af   :  { %v439_v62 = vmax.f32 %v435_v59, 0.0 }
 0x2b1   :  { %v440_v63 = vpack.c.bf16 %v439_v62, %v438_v61 }
 0x2b3   :  { %712 = vmatmul.mubr.bf16.vlgmr.msra.gmra.mxu1 %v440_v63 }
 0x373   :  { %v546_v1 = vpop.f32.mrf.mxu1 }
 0x374   :  { %v547_v2 = vadd.f32 %v590_v0, %v546_v1 }
 0x375   :  { %v713_v3 = vpop.f32.mrf.mxu1 }
 0x376   :  { %553 = vst [vmem:[%s994_s9] sm:$0xff] %v547_v2 }
 0x377   :  { %v549_v4 = vpop.f32.mrf.mxu1 }
 0x378   :  { %v550_v5 = vadd.f32 %v590_v0, %v549_v4 }
 0x379   :  { %v714_v6 = vpop.f32.mrf.mxu1 }
 0x37a   :  { %554 = vst [vmem:[%s994_s9 + $0x8] sm:$0xff] %v550_v5 }
 0x37b   :  { %559 = vsyncpa [#allocation3], 1 }
 0x37c   :  { %560 = vsyncpa [#allocation5], 1 }
 0x37d   :  { %561 = vsyncpa [#allocation8], 1 }

</bundles_post_ra>
